<compile_context>
chip_gen: v7x
topology: tpu7x:2x2x1
jax: 0.10.0
libtpu: 0.0.40
codegen_flags: <defaults>
</compile_context>

<pallas_src>
import functools

import jax
import jax.numpy as jnp
from jax.experimental import pallas as pl
from jax.experimental.pallas import tpu as pltpu


# ----------------------- Pallas kernel: DKVMN memory scan -------------------

def dkvmn_scan_kernel(init_mv_ref, corr_ref, erase_ref, add_ref, read_ref,
                      mv_scratch, *, chunk):
    """Sequential scan over one chunk of timesteps for one batch tile.

    corr_ref/erase_ref/add_ref: (chunk, Bt, M) / (chunk, Bt, V) / (chunk, Bt, V)
    read_ref:                   (chunk, Bt, V) output
    mv_scratch:                 (Bt, M, V) persistent value memory
    """
    # New batch tile -> (re)initialize the value memory (broadcast over batch).
    @pl.when(pl.program_id(1) == 0)
    def _():
        mv_scratch[...] = jnp.broadcast_to(init_mv_ref[...][None],
                                           mv_scratch.shape)

    # Fully-unrolled inner loop over the chunk (static trip count and indices,
    # equivalent to lax.fori_loop(..., unroll=True)); Mv stays in registers.
    mv = mv_scratch[...]                                        # (Bt, M, V)
    for tt in range(chunk):
        cw = corr_ref[tt][:, :, None]                           # (Bt, M, 1)
        read_ref[tt] = jnp.sum(cw * mv, axis=1)                 # (Bt, V)
        er = erase_ref[tt][:, None, :]                          # (Bt, 1, V)
        ad = add_ref[tt][:, None, :]                            # (Bt, 1, V)
        # NOTE: the PyTorch reference skips this write at the final timestep;
        # doing it anyway is observationally identical (Mv is never read
        # afterwards) and makes zero-padded timesteps (cw == 0) exact no-ops.
        mv = mv * (1.0 - cw * er) + cw * ad
    mv_scratch[...] = mv


# ------------------------------ forward wrapper ------------------------------

def deep_gpcm_coral_forward(params, q_data, r_data, *, n_questions, n_cats,
                            ability_scale, chunk=8, batch_tile=None):
    """Returns (theta (B,T), betas (B,T,K-1), alpha (B,T), probs (B,T,K))."""
    B, T = q_data.shape
    key_dim = params['q_embed'].shape[1]
    memory_size, value_dim = params['init_mv'].shape
    f32 = jnp.float32

    # ---------------- hoisted, recurrence-independent batched math -----------
    q_embed = params['q_embed'][q_data].astype(f32)               # (B, T, Kd)

    # DKVMN attention (depends only on q_embed) -> correlation weights.
    corr_w = jax.nn.softmax(q_embed @ params['Mk'].T, axis=-1)    # (B, T, M)

    # linear_decay response embedding folded into the value-embed Linear as a
    # gather:  ve = sum_k w_k * Wv[k, q-1] + bv   (no (B,T,K*Q) tensor).
    kcat = jnp.arange(n_cats, dtype=f32)
    w_tri = jnp.maximum(
        0.0, 1.0 - jnp.abs(kcat[None, None, :]
                           - r_data[..., None].astype(f32)) / (n_cats - 1))
    Wv_kqv = params['Wv'].reshape(n_cats, n_questions, value_dim)
    qm1 = jnp.clip(q_data - 1, 0, n_questions - 1)
    gathered = Wv_kqv[:, qm1, :]                                  # (K, B, T, V)
    valid = (q_data > 0).astype(f32)[..., None]                   # 0 = padding id
    ve = jnp.einsum('btk,kbtv->btv', w_tri, gathered) * valid + params['bv'][0]

    erase = jax.nn.sigmoid(ve @ params['We'] + params['be'][0])   # (B, T, V)
    add = jnp.tanh(ve @ params['Wa'] + params['ba'][0])           # (B, T, V)

    betas = q_embed @ params['Wth'] + params['bth'][0]            # (B, T, K-1)

    # ---------------- Pallas sequential scan (the only true recurrence) ------
    Bt = B if batch_tile is None else int(batch_tile)
    if Bt != B:
        # sub-batch blocks must be sublane aligned (second-to-last block dim)
        assert Bt % 8 == 0, "batch_tile must be a multiple of 8 when < batch"
    B_pad = -(-B // Bt) * Bt
    T_pad = -(-T // chunk) * chunk

    def seq_major(x):                                             # (B,T,f) -> padded (T,B,f)
        x = jnp.transpose(x, (1, 0, 2)).astype(f32)
        return jnp.pad(x, ((0, T_pad - T), (0, B_pad - B), (0, 0)))

    corr_s, erase_s, add_s = seq_major(corr_w), seq_major(erase), seq_major(add)

    def step_spec(feat):
        return pl.BlockSpec((chunk, Bt, feat), lambda b, t: (t, b, 0))

    read_s = pl.pallas_call(
        functools.partial(dkvmn_scan_kernel, chunk=chunk),
        out_shape=jax.ShapeDtypeStruct((T_pad, B_pad, value_dim), f32),
        grid_spec=pltpu.PrefetchScalarGridSpec(
            num_scalar_prefetch=0,
            grid=(B_pad // Bt, T_pad // chunk),
            in_specs=[
                pl.BlockSpec((memory_size, value_dim), lambda b, t: (0, 0)),
                step_spec(memory_size),
                step_spec(value_dim),
                step_spec(value_dim),
            ],
            out_specs=step_spec(value_dim),
            scratch_shapes=[pltpu.VMEM((Bt, memory_size, value_dim), f32)],
        ),
        # batch tiles are independent -> parallel (megacore on v7x);
        # time chunks carry the memory scratch -> arbitrary (sequential).
        # For production B/T, also set vmem_limit_bytes here (v7x: 64 MiB VMEM).
        compiler_params=pltpu.CompilerParams(
            dimension_semantics=("parallel", "arbitrary")),
    )(params['init_mv'].astype(f32), corr_s, erase_s, add_s)

    read = jnp.transpose(read_s[:T, :B], (1, 0, 2))               # (B, T, V)

    # ---------------- hoisted batched heads (summary, IRT, CORAL) ------------
    summary = jnp.tanh(jnp.concatenate([read, q_embed], axis=-1) @ params['Wsum']
                       + params['bsum'][0])                       # (B, T, F)
    dc_in = jnp.concatenate([summary, q_embed], axis=-1)          # (B, T, F+Kd)

    # fused [ability | discrimination | CORAL] head: one (F+Kd, 3) matmul.
    W_heads = jnp.concatenate([
        jnp.concatenate([params['Wab'], jnp.zeros((key_dim, 1), f32)], axis=0),
        params['Wd'], params['Wc']], axis=1)                      # (F+Kd, 3)
    b_heads = jnp.concatenate([params['bab'][0], params['bd'][0],
                               jnp.zeros((1,), f32)])             # (3,)
    z = dc_in @ W_heads + b_heads                                 # (B, T, 3)

    theta = z[..., 0] * ability_scale                             # (B, T)
    alpha = jax.nn.softplus(z[..., 1])                            # (B, T)

    cum = jax.nn.sigmoid(z[..., 2:3] + params['bc'][0])           # (B, T, K-1)
    ones = jnp.ones(cum.shape[:-1] + (1,), f32)
    zeros = jnp.zeros(cum.shape[:-1] + (1,), f32)
    probs = (jnp.concatenate([ones, cum], axis=-1)
             - jnp.concatenate([cum, zeros], axis=-1))            # (B, T, K)

    return theta, betas, alpha, probs


# -------------------- pure-JAX reference (original per-step loop) -----------

def reference_forward(params, q_data, r_data, *, n_questions, n_cats,
                      ability_scale):
    B, T = q_data.shape
    f32 = jnp.float32
    q_one_hot = jax.nn.one_hot(q_data, n_questions + 1, dtype=f32)[:, :, 1:]
    Mv = jnp.broadcast_to(params['init_mv'][None],
                          (B,) + params['init_mv'].shape).astype(f32)
    kcat = jnp.arange(n_cats, dtype=f32)
    thetas, betas_l, alphas, probs_l = [], [], [], []
    for t in range(T):
        qe = params['q_embed'][q_data[:, t]].astype(f32)
        w_tri = jnp.maximum(0.0, 1.0 - jnp.abs(
            kcat[None, :] - r_data[:, t, None].astype(f32)) / (n_cats - 1))
        ge = (w_tri[:, :, None] * q_one_hot[:, t][:, None, :]).reshape(B, -1)
        ve = ge @ params['Wv'] + params['bv'][0]
        cw = jax.nn.softmax(qe @ params['Mk'].T, axis=-1)
        read = jnp.sum(cw[:, :, None] * Mv, axis=1)
        summary = jnp.tanh(jnp.concatenate([read, qe], -1) @ params['Wsum']
                           + params['bsum'][0])
        theta = (summary @ params['Wab'] + params['bab'][0])[:, 0] * ability_scale
        beta = qe @ params['Wth'] + params['bth'][0]
        dc = jnp.concatenate([summary, qe], -1)
        alpha = jax.nn.softplus(dc @ params['Wd'] + params['bd'][0])[:, 0]
        cum = jax.nn.sigmoid(dc @ params['Wc'] + params['bc'][0])
        pr = (jnp.concatenate([jnp.ones((B, 1), f32), cum], -1)
              - jnp.concatenate([cum, jnp.zeros((B, 1), f32)], -1))
        thetas.append(theta); betas_l.append(beta)
        alphas.append(alpha); probs_l.append(pr)
        if t < T - 1:
            er = jax.nn.sigmoid(ve @ params['We'] + params['be'][0])
            ad = jnp.tanh(ve @ params['Wa'] + params['ba'][0])
            Mv = Mv * (1.0 - cw[:, :, None] * er[:, None, :]) \
                 + cw[:, :, None] * ad[:, None, :]
    return (jnp.stack(thetas, 1), jnp.stack(betas_l, 1),
            jnp.stack(alphas, 1), jnp.stack(probs_l, 1))


# ----------------------------- deterministic init ---------------------------

def init_params(key, *, n_questions, n_cats, memory_size, key_dim, value_dim,
                final_fc_dim):
    ks = jax.random.split(key, 18)
    w = lambda k, shape, s=0.1: (s * jax.random.normal(k, shape)).astype(jnp.float32)
    KQ = n_cats * n_questions
    return {
        'q_embed': w(ks[0], (n_questions + 1, key_dim)),
        'Mk': w(ks[1], (memory_size, key_dim)),
        'init_mv': w(ks[2], (memory_size, value_dim)),
        'Wv': w(ks[3], (KQ, value_dim)), 'bv': w(ks[4], (1, value_dim)),
        'We': w(ks[5], (value_dim, value_dim)), 'be': w(ks[6], (1, value_dim)),
        'Wa': w(ks[7], (value_dim, value_dim)), 'ba': w(ks[8], (1, value_dim)),
        'Wsum': w(ks[9], (value_dim + key_dim, final_fc_dim)),
        'bsum': w(ks[10], (1, final_fc_dim)),
        'Wab': w(ks[11], (final_fc_dim, 1)), 'bab': w(ks[12], (1, 1)),
        'Wth': w(ks[13], (key_dim, n_cats - 1)), 'bth': w(ks[14], (1, n_cats - 1)),
        'Wd': w(ks[15], (final_fc_dim + key_dim, 1)), 'bd': w(ks[16], (1, 1)),
        'Wc': w(ks[17], (final_fc_dim + key_dim, 1)),
        # decreasing CORAL biases -> monotone cumulative probs (rank-consistent)
        'bc': jnp.linspace(1.0, -1.0, n_cats - 1, dtype=jnp.float32).reshape(1, n_cats - 1),
    }


# ----------------------------------- main -----------------------------------

if __name__ == "__main__":
    n_questions, n_cats = 10, 4
    memory_size, key_dim, value_dim, final_fc_dim = 8, 16, 16, 16
    ability_scale = 3.0
    batch, seq_len = 2, 8

    root = jax.random.PRNGKey(0)
    pkey, qkey, rkey = jax.random.split(root, 3)
    params = init_params(pkey, n_questions=n_questions, n_cats=n_cats,
                         memory_size=memory_size, key_dim=key_dim,
                         value_dim=value_dim, final_fc_dim=final_fc_dim)

    q_data = jax.random.randint(qkey, (batch, seq_len), 1, n_questions + 1)  # 0 is padding id
    r_data = jax.random.randint(rkey, (batch, seq_len), 0, n_cats)

    fwd = jax.jit(functools.partial(
        deep_gpcm_coral_forward, n_questions=n_questions, n_cats=n_cats,
        ability_scale=ability_scale, chunk=seq_len))

    with jax.default_matmul_precision("highest"):
        outs = jax.block_until_ready(fwd(params, q_data, r_data))
        refs = reference_forward(params, q_data, r_data,
                                 n_questions=n_questions, n_cats=n_cats,
                                 ability_scale=ability_scale)

    theta, betas, alpha, probs = outs
    assert theta.shape == (batch, seq_len)
    assert betas.shape == (batch, seq_len, n_cats - 1)
    assert alpha.shape == (batch, seq_len)
    assert probs.shape == (batch, seq_len, n_cats)
    assert bool(jnp.all(jnp.isfinite(probs)))
    for got, want in zip(outs, refs):
        err = float(jnp.max(jnp.abs(got - want)))
        assert jnp.allclose(got, want, atol=1e-3, rtol=1e-2), err
    print("KERNEL_OK")
</pallas_src>

<mosaic_0001>
module attributes {stable_mosaic.version = 11 : i64} {
  func.func @dkvmn_scan_kernel(%arg0: i32, %arg1: i32, %arg2: memref<8x16xf32, #tpu.memory_space<vmem>>, %arg3: memref<8x2x8xf32, #tpu.memory_space<vmem>>, %arg4: memref<8x2x16xf32, #tpu.memory_space<vmem>>, %arg5: memref<8x2x16xf32, #tpu.memory_space<vmem>>, %arg6: memref<8x2x16xf32, #tpu.memory_space<vmem>>, %arg7: memref<2x8x16xf32, #tpu.memory_space<vmem>>) attributes {dimension_semantics = [#tpu.dimension_semantics<parallel>, #tpu.dimension_semantics<arbitrary>], iteration_bounds = array<i64: 1, 1>, scalar_prefetch = 0 : i64, scratch_operands = 1 : i64, tpu.core_type = #tpu.core_type<tc>, window_params = [{pipeline_mode = #tpu.pipeline_mode<synchronous>, transform_indices = @transform_0, window_bounds = array<i64: 8, 16>}, {transform_indices = @transform_1, window_bounds = array<i64: 8, 2, 8>}, {transform_indices = @transform_2, window_bounds = array<i64: 8, 2, 16>}, {transform_indices = @transform_3, window_bounds = array<i64: 8, 2, 16>}, {transform_indices = @transform_4, window_bounds = array<i64: 8, 2, 16>}]} {
    %c0_i32 = arith.constant 0 : i32
    %0 = arith.cmpi eq, %arg1, %c0_i32 : i32
    %1 = arith.extui %0 : i1 to i32
    %c0_i32_0 = arith.constant 0 : i32
    %2 = arith.cmpi ne, %1, %c0_i32_0 : i32
    scf.if %2 {
      %c0_110 = arith.constant 0 : index
      %c0_111 = arith.constant 0 : index
      %205 = vector.load %arg2[%c0_110, %c0_111] : memref<8x16xf32, #tpu.memory_space<vmem>>, vector<8x16xf32>
      %206 = vector.shape_cast %205 : vector<8x16xf32> to vector<1x8x16xf32>
      %207 = vector.shape_cast %206 : vector<1x8x16xf32> to vector<1x8x16xf32>
      %208 = vector.broadcast %207 : vector<1x8x16xf32> to vector<2x8x16xf32>
      %c0_112 = arith.constant 0 : index
      %c0_113 = arith.constant 0 : index
      %c0_114 = arith.constant 0 : index
      %209 = vector.load %arg7[%c0_112, %c0_113, %c0_114] : memref<2x8x16xf32, #tpu.memory_space<vmem>>, vector<2x8x16xf32>
      tpu.vector_store %arg7[%c0_112, %c0_113, %c0_114], %208 {strides = array<i32>} : memref<2x8x16xf32, #tpu.memory_space<vmem>>, vector<2x8x16xf32>,
    } else {
    }
    %c0 = arith.constant 0 : index
    %c0_1 = arith.constant 0 : index
    %c0_2 = arith.constant 0 : index
    %3 = vector.load %arg7[%c0, %c0_1, %c0_2] : memref<2x8x16xf32, #tpu.memory_space<vmem>>, vector<2x8x16xf32>
    %c0_3 = arith.constant 0 : index
    %c0_4 = arith.constant 0 : index
    %c0_5 = arith.constant 0 : index
    %4 = vector.load %arg3[%c0_3, %c0_4, %c0_5] : memref<8x2x8xf32, #tpu.memory_space<vmem>>, vector<1x2x8xf32>
    %5 = vector.shape_cast %4 : vector<1x2x8xf32> to vector<2x8xf32>
    %6 = vector.shape_cast %5 : vector<2x8xf32> to vector<2x8x1xf32>
    %7 = vector.broadcast %6 : vector<2x8x1xf32> to vector<2x8x16xf32>
    %8 = arith.mulf %7, %3 : vector<2x8x16xf32>
    %cst = arith.constant dense<0.000000e+00> : vector<2x16xf32>
    %9 = vector.multi_reduction <add>, %8, %cst [1] : vector<2x8x16xf32> to vector<2x16xf32>
    %c0_6 = arith.constant 0 : index
    %c0_7 = arith.constant 0 : index
    %c0_8 = arith.constant 0 : index
    %10 = vector.load %arg6[%c0_6, %c0_7, %c0_8] : memref<8x2x16xf32, #tpu.memory_space<vmem>>, vector<1x2x16xf32>
    %11 = vector.shape_cast %10 : vector<1x2x16xf32> to vector<2x16xf32>
    %12 = vector.shape_cast %9 : vector<2x16xf32> to vector<1x2x16xf32>
    tpu.vector_store %arg6[%c0_6, %c0_7, %c0_8], %12 {strides = array<i32>} : memref<8x2x16xf32, #tpu.memory_space<vmem>>, vector<1x2x16xf32>,
    %c0_9 = arith.constant 0 : index
    %c0_10 = arith.constant 0 : index
    %c0_11 = arith.constant 0 : index
    %13 = vector.load %arg4[%c0_9, %c0_10, %c0_11] : memref<8x2x16xf32, #tpu.memory_space<vmem>>, vector<1x2x16xf32>
    %14 = vector.shape_cast %13 : vector<1x2x16xf32> to vector<2x16xf32>
    %15 = vector.shape_cast %14 : vector<2x16xf32> to vector<2x1x16xf32>
    %c0_12 = arith.constant 0 : index
    %c0_13 = arith.constant 0 : index
    %c0_14 = arith.constant 0 : index
    %16 = vector.load %arg5[%c0_12, %c0_13, %c0_14] : memref<8x2x16xf32, #tpu.memory_space<vmem>>, vector<1x2x16xf32>
    %17 = vector.shape_cast %16 : vector<1x2x16xf32> to vector<2x16xf32>
    %18 = vector.shape_cast %17 : vector<2x16xf32> to vector<2x1x16xf32>
    %19 = vector.broadcast %6 : vector<2x8x1xf32> to vector<2x8x16xf32>
    %20 = vector.broadcast %15 : vector<2x1x16xf32> to vector<2x8x16xf32>
    %21 = arith.mulf %19, %20 : vector<2x8x16xf32>
    %cst_15 = arith.constant 1.000000e+00 : f32
    %22 = vector.broadcast %cst_15 : f32 to vector<2x8x16xf32>
    %23 = arith.subf %22, %21 : vector<2x8x16xf32>
    %24 = arith.mulf %3, %23 : vector<2x8x16xf32>
    %25 = vector.broadcast %6 : vector<2x8x1xf32> to vector<2x8x16xf32>
    %26 = vector.broadcast %18 : vector<2x1x16xf32> to vector<2x8x16xf32>
    %27 = arith.mulf %25, %26 : vector<2x8x16xf32>
    %28 = arith.addf %24, %27 : vector<2x8x16xf32>
    %c1 = arith.constant 1 : index
    %c0_16 = arith.constant 0 : index
    %c0_17 = arith.constant 0 : index
    %29 = vector.load %arg3[%c1, %c0_16, %c0_17] : memref<8x2x8xf32, #tpu.memory_space<vmem>>, vector<1x2x8xf32>
    %30 = vector.shape_cast %29 : vector<1x2x8xf32> to vector<2x8xf32>
    %31 = vector.shape_cast %30 : vector<2x8xf32> to vector<2x8x1xf32>
    %32 = vector.broadcast %31 : vector<2x8x1xf32> to vector<2x8x16xf32>
    %33 = arith.mulf %32, %28 : vector<2x8x16xf32>
    %cst_18 = arith.constant dense<0.000000e+00> : vector<2x16xf32>
    %34 = vector.multi_reduction <add>, %33, %cst_18 [1] : vector<2x8x16xf32> to vector<2x16xf32>
    %c1_19 = arith.constant 1 : index
    %c0_20 = arith.constant 0 : index
    %c0_21 = arith.constant 0 : index
    %35 = vector.load %arg6[%c1_19, %c0_20, %c0_21] : memref<8x2x16xf32, #tpu.memory_space<vmem>>, vector<1x2x16xf32>
    %36 = vector.shape_cast %35 : vector<1x2x16xf32> to vector<2x16xf32>
    %37 = vector.shape_cast %34 : vector<2x16xf32> to vector<1x2x16xf32>
    tpu.vector_store %arg6[%c1_19, %c0_20, %c0_21], %37 {strides = array<i32>} : memref<8x2x16xf32, #tpu.memory_space<vmem>>, vector<1x2x16xf32>,
    %c1_22 = arith.constant 1 : index
    %c0_23 = arith.constant 0 : index
    %c0_24 = arith.constant 0 : index
    %38 = vector.load %arg4[%c1_22, %c0_23, %c0_24] : memref<8x2x16xf32, #tpu.memory_space<vmem>>, vector<1x2x16xf32>
    %39 = vector.shape_cast %38 : vector<1x2x16xf32> to vector<2x16xf32>
    %40 = vector.shape_cast %39 : vector<2x16xf32> to vector<2x1x16xf32>
    %c1_25 = arith.constant 1 : index
    %c0_26 = arith.constant 0 : index
    %c0_27 = arith.constant 0 : index
    %41 = vector.load %arg5[%c1_25, %c0_26, %c0_27] : memref<8x2x16xf32, #tpu.memory_space<vmem>>, vector<1x2x16xf32>
    %42 = vector.shape_cast %41 : vector<1x2x16xf32> to vector<2x16xf32>
    %43 = vector.shape_cast %42 : vector<2x16xf32> to vector<2x1x16xf32>
    %44 = vector.broadcast %31 : vector<2x8x1xf32> to vector<2x8x16xf32>
    %45 = vector.broadcast %40 : vector<2x1x16xf32> to vector<2x8x16xf32>
    %46 = arith.mulf %44, %45 : vector<2x8x16xf32>
    %cst_28 = arith.constant 1.000000e+00 : f32
    %47 = vector.broadcast %cst_28 : f32 to vector<2x8x16xf32>
    %48 = arith.subf %47, %46 : vector<2x8x16xf32>
    %49 = arith.mulf %28, %48 : vector<2x8x16xf32>
    %50 = vector.broadcast %31 : vector<2x8x1xf32> to vector<2x8x16xf32>
    %51 = vector.broadcast %43 : vector<2x1x16xf32> to vector<2x8x16xf32>
    %52 = arith.mulf %50, %51 : vector<2x8x16xf32>
    %53 = arith.addf %49, %52 : vector<2x8x16xf32>
    %c2 = arith.constant 2 : index
    %c0_29 = arith.constant 0 : index
    %c0_30 = arith.constant 0 : index
    %54 = vector.load %arg3[%c2, %c0_29, %c0_30] : memref<8x2x8xf32, #tpu.memory_space<vmem>>, vector<1x2x8xf32>
    %55 = vector.shape_cast %54 : vector<1x2x8xf32> to vector<2x8xf32>
    %56 = vector.shape_cast %55 : vector<2x8xf32> to vector<2x8x1xf32>
    %57 = vector.broadcast %56 : vector<2x8x1xf32> to vector<2x8x16xf32>
    %58 = arith.mulf %57, %53 : vector<2x8x16xf32>
    %cst_31 = arith.constant dense<0.000000e+00> : vector<2x16xf32>
    %59 = vector.multi_reduction <add>, %58, %cst_31 [1] : vector<2x8x16xf32> to vector<2x16xf32>
    %c2_32 = arith.constant 2 : index
    %c0_33 = arith.constant 0 : index
    %c0_34 = arith.constant 0 : index
    %60 = vector.load %arg6[%c2_32, %c0_33, %c0_34] : memref<8x2x16xf32, #tpu.memory_space<vmem>>, vector<1x2x16xf32>
    %61 = vector.shape_cast %60 : vector<1x2x16xf32> to vector<2x16xf32>
    %62 = vector.shape_cast %59 : vector<2x16xf32> to vector<1x2x16xf32>
    tpu.vector_store %arg6[%c2_32, %c0_33, %c0_34], %62 {strides = array<i32>} : memref<8x2x16xf32, #tpu.memory_space<vmem>>, vector<1x2x16xf32>,
    %c2_35 = arith.constant 2 : index
    %c0_36 = arith.constant 0 : index
    %c0_37 = arith.constant 0 : index
    %63 = vector.load %arg4[%c2_35, %c0_36, %c0_37] : memref<8x2x16xf32, #tpu.memory_space<vmem>>, vector<1x2x16xf32>
    %64 = vector.shape_cast %63 : vector<1x2x16xf32> to vector<2x16xf32>
    %65 = vector.shape_cast %64 : vector<2x16xf32> to vector<2x1x16xf32>
    %c2_38 = arith.constant 2 : index
    %c0_39 = arith.constant 0 : index
    %c0_40 = arith.constant 0 : index
    %66 = vector.load %arg5[%c2_38, %c0_39, %c0_40] : memref<8x2x16xf32, #tpu.memory_space<vmem>>, vector<1x2x16xf32>
    %67 = vector.shape_cast %66 : vector<1x2x16xf32> to vector<2x16xf32>
    %68 = vector.shape_cast %67 : vector<2x16xf32> to vector<2x1x16xf32>
    %69 = vector.broadcast %56 : vector<2x8x1xf32> to vector<2x8x16xf32>
    %70 = vector.broadcast %65 : vector<2x1x16xf32> to vector<2x8x16xf32>
    %71 = arith.mulf %69, %70 : vector<2x8x16xf32>
    %cst_41 = arith.constant 1.000000e+00 : f32
    %72 = vector.broadcast %cst_41 : f32 to vector<2x8x16xf32>
    %73 = arith.subf %72, %71 : vector<2x8x16xf32>
    %74 = arith.mulf %53, %73 : vector<2x8x16xf32>
    %75 = vector.broadcast %56 : vector<2x8x1xf32> to vector<2x8x16xf32>
    %76 = vector.broadcast %68 : vector<2x1x16xf32> to vector<2x8x16xf32>
    %77 = arith.mulf %75, %76 : vector<2x8x16xf32>
    %78 = arith.addf %74, %77 : vector<2x8x16xf32>
    %c3 = arith.constant 3 : index
    %c0_42 = arith.constant 0 : index
    %c0_43 = arith.constant 0 : index
    %79 = vector.load %arg3[%c3, %c0_42, %c0_43] : memref<8x2x8xf32, #tpu.memory_space<vmem>>, vector<1x2x8xf32>
    %80 = vector.shape_cast %79 : vector<1x2x8xf32> to vector<2x8xf32>
    %81 = vector.shape_cast %80 : vector<2x8xf32> to vector<2x8x1xf32>
    %82 = vector.broadcast %81 : vector<2x8x1xf32> to vector<2x8x16xf32>
    %83 = arith.mulf %82, %78 : vector<2x8x16xf32>
    %cst_44 = arith.constant dense<0.000000e+00> : vector<2x16xf32>
    %84 = vector.multi_reduction <add>, %83, %cst_44 [1] : vector<2x8x16xf32> to vector<2x16xf32>
    %c3_45 = arith.constant 3 : index
    %c0_46 = arith.constant 0 : index
    %c0_47 = arith.constant 0 : index
    %85 = vector.load %arg6[%c3_45, %c0_46, %c0_47] : memref<8x2x16xf32, #tpu.memory_space<vmem>>, vector<1x2x16xf32>
    %86 = vector.shape_cast %85 : vector<1x2x16xf32> to vector<2x16xf32>
    %87 = vector.shape_cast %84 : vector<2x16xf32> to vector<1x2x16xf32>
    tpu.vector_store %arg6[%c3_45, %c0_46, %c0_47], %87 {strides = array<i32>} : memref<8x2x16xf32, #tpu.memory_space<vmem>>, vector<1x2x16xf32>,
    %c3_48 = arith.constant 3 : index
    %c0_49 = arith.constant 0 : index
    %c0_50 = arith.constant 0 : index
    %88 = vector.load %arg4[%c3_48, %c0_49, %c0_50] : memref<8x2x16xf32, #tpu.memory_space<vmem>>, vector<1x2x16xf32>
    %89 = vector.shape_cast %88 : vector<1x2x16xf32> to vector<2x16xf32>
    %90 = vector.shape_cast %89 : vector<2x16xf32> to vector<2x1x16xf32>
    %c3_51 = arith.constant 3 : index
    %c0_52 = arith.constant 0 : index
    %c0_53 = arith.constant 0 : index
    %91 = vector.load %arg5[%c3_51, %c0_52, %c0_53] : memref<8x2x16xf32, #tpu.memory_space<vmem>>, vector<1x2x16xf32>
    %92 = vector.shape_cast %91 : vector<1x2x16xf32> to vector<2x16xf32>
    %93 = vector.shape_cast %92 : vector<2x16xf32> to vector<2x1x16xf32>
    %94 = vector.broadcast %81 : vector<2x8x1xf32> to vector<2x8x16xf32>
    %95 = vector.broadcast %90 : vector<2x1x16xf32> to vector<2x8x16xf32>
    %96 = arith.mulf %94, %95 : vector<2x8x16xf32>
    %cst_54 = arith.constant 1.000000e+00 : f32
    %97 = vector.broadcast %cst_54 : f32 to vector<2x8x16xf32>
    %98 = arith.subf %97, %96 : vector<2x8x16xf32>
    %99 = arith.mulf %78, %98 : vector<2x8x16xf32>
    %100 = vector.broadcast %81 : vector<2x8x1xf32> to vector<2x8x16xf32>
    %101 = vector.broadcast %93 : vector<2x1x16xf32> to vector<2x8x16xf32>
    %102 = arith.mulf %100, %101 : vector<2x8x16xf32>
    %103 = arith.addf %99, %102 : vector<2x8x16xf32>
    %c4 = arith.constant 4 : index
    %c0_55 = arith.constant 0 : index
    %c0_56 = arith.constant 0 : index
    %104 = vector.load %arg3[%c4, %c0_55, %c0_56] : memref<8x2x8xf32, #tpu.memory_space<vmem>>, vector<1x2x8xf32>
    %105 = vector.shape_cast %104 : vector<1x2x8xf32> to vector<2x8xf32>
    %106 = vector.shape_cast %105 : vector<2x8xf32> to vector<2x8x1xf32>
    %107 = vector.broadcast %106 : vector<2x8x1xf32> to vector<2x8x16xf32>
    %108 = arith.mulf %107, %103 : vector<2x8x16xf32>
    %cst_57 = arith.constant dense<0.000000e+00> : vector<2x16xf32>
    %109 = vector.multi_reduction <add>, %108, %cst_57 [1] : vector<2x8x16xf32> to vector<2x16xf32>
    %c4_58 = arith.constant 4 : index
    %c0_59 = arith.constant 0 : index
    %c0_60 = arith.constant 0 : index
    %110 = vector.load %arg6[%c4_58, %c0_59, %c0_60] : memref<8x2x16xf32, #tpu.memory_space<vmem>>, vector<1x2x16xf32>
    %111 = vector.shape_cast %110 : vector<1x2x16xf32> to vector<2x16xf32>
    %112 = vector.shape_cast %109 : vector<2x16xf32> to vector<1x2x16xf32>
    tpu.vector_store %arg6[%c4_58, %c0_59, %c0_60], %112 {strides = array<i32>} : memref<8x2x16xf32, #tpu.memory_space<vmem>>, vector<1x2x16xf32>,
    %c4_61 = arith.constant 4 : index
    %c0_62 = arith.constant 0 : index
    %c0_63 = arith.constant 0 : index
    %113 = vector.load %arg4[%c4_61, %c0_62, %c0_63] : memref<8x2x16xf32, #tpu.memory_space<vmem>>, vector<1x2x16xf32>
    %114 = vector.shape_cast %113 : vector<1x2x16xf32> to vector<2x16xf32>
    %115 = vector.shape_cast %114 : vector<2x16xf32> to vector<2x1x16xf32>
    %c4_64 = arith.constant 4 : index
    %c0_65 = arith.constant 0 : index
    %c0_66 = arith.constant 0 : index
    %116 = vector.load %arg5[%c4_64, %c0_65, %c0_66] : memref<8x2x16xf32, #tpu.memory_space<vmem>>, vector<1x2x16xf32>
    %117 = vector.shape_cast %116 : vector<1x2x16xf32> to vector<2x16xf32>
    %118 = vector.shape_cast %117 : vector<2x16xf32> to vector<2x1x16xf32>
    %119 = vector.broadcast %106 : vector<2x8x1xf32> to vector<2x8x16xf32>
    %120 = vector.broadcast %115 : vector<2x1x16xf32> to vector<2x8x16xf32>
    %121 = arith.mulf %119, %120 : vector<2x8x16xf32>
    %cst_67 = arith.constant 1.000000e+00 : f32
    %122 = vector.broadcast %cst_67 : f32 to vector<2x8x16xf32>
    %123 = arith.subf %122, %121 : vector<2x8x16xf32>
    %124 = arith.mulf %103, %123 : vector<2x8x16xf32>
    %125 = vector.broadcast %106 : vector<2x8x1xf32> to vector<2x8x16xf32>
    %126 = vector.broadcast %118 : vector<2x1x16xf32> to vector<2x8x16xf32>
    %127 = arith.mulf %125, %126 : vector<2x8x16xf32>
    %128 = arith.addf %124, %127 : vector<2x8x16xf32>
    %c5 = arith.constant 5 : index
    %c0_68 = arith.constant 0 : index
    %c0_69 = arith.constant 0 : index
    %129 = vector.load %arg3[%c5, %c0_68, %c0_69] : memref<8x2x8xf32, #tpu.memory_space<vmem>>, vector<1x2x8xf32>
    %130 = vector.shape_cast %129 : vector<1x2x8xf32> to vector<2x8xf32>
    %131 = vector.shape_cast %130 : vector<2x8xf32> to vector<2x8x1xf32>
    %132 = vector.broadcast %131 : vector<2x8x1xf32> to vector<2x8x16xf32>
    %133 = arith.mulf %132, %128 : vector<2x8x16xf32>
    %cst_70 = arith.constant dense<0.000000e+00> : vector<2x16xf32>
    %134 = vector.multi_reduction <add>, %133, %cst_70 [1] : vector<2x8x16xf32> to vector<2x16xf32>
    %c5_71 = arith.constant 5 : index
    %c0_72 = arith.constant 0 : index
    %c0_73 = arith.constant 0 : index
    %135 = vector.load %arg6[%c5_71, %c0_72, %c0_73] : memref<8x2x16xf32, #tpu.memory_space<vmem>>, vector<1x2x16xf32>
    %136 = vector.shape_cast %135 : vector<1x2x16xf32> to vector<2x16xf32>
    %137 = vector.shape_cast %134 : vector<2x16xf32> to vector<1x2x16xf32>
    tpu.vector_store %arg6[%c5_71, %c0_72, %c0_73], %137 {strides = array<i32>} : memref<8x2x16xf32, #tpu.memory_space<vmem>>, vector<1x2x16xf32>,
    %c5_74 = arith.constant 5 : index
    %c0_75 = arith.constant 0 : index
    %c0_76 = arith.constant 0 : index
    %138 = vector.load %arg4[%c5_74, %c0_75, %c0_76] : memref<8x2x16xf32, #tpu.memory_space<vmem>>, vector<1x2x16xf32>
    %139 = vector.shape_cast %138 : vector<1x2x16xf32> to vector<2x16xf32>
    %140 = vector.shape_cast %139 : vector<2x16xf32> to vector<2x1x16xf32>
    %c5_77 = arith.constant 5 : index
    %c0_78 = arith.constant 0 : index
    %c0_79 = arith.constant 0 : index
    %141 = vector.load %arg5[%c5_77, %c0_78, %c0_79] : memref<8x2x16xf32, #tpu.memory_space<vmem>>, vector<1x2x16xf32>
    %142 = vector.shape_cast %141 : vector<1x2x16xf32> to vector<2x16xf32>
    %143 = vector.shape_cast %142 : vector<2x16xf32> to vector<2x1x16xf32>
    %144 = vector.broadcast %131 : vector<2x8x1xf32> to vector<2x8x16xf32>
    %145 = vector.broadcast %140 : vector<2x1x16xf32> to vector<2x8x16xf32>
    %146 = arith.mulf %144, %145 : vector<2x8x16xf32>
    %cst_80 = arith.constant 1.000000e+00 : f32
    %147 = vector.broadcast %cst_80 : f32 to vector<2x8x16xf32>
    %148 = arith.subf %147, %146 : vector<2x8x16xf32>
    %149 = arith.mulf %128, %148 : vector<2x8x16xf32>
    %150 = vector.broadcast %131 : vector<2x8x1xf32> to vector<2x8x16xf32>
    %151 = vector.broadcast %143 : vector<2x1x16xf32> to vector<2x8x16xf32>
    %152 = arith.mulf %150, %151 : vector<2x8x16xf32>
    %153 = arith.addf %149, %152 : vector<2x8x16xf32>
    %c6 = arith.constant 6 : index
    %c0_81 = arith.constant 0 : index
    %c0_82 = arith.constant 0 : index
    %154 = vector.load %arg3[%c6, %c0_81, %c0_82] : memref<8x2x8xf32, #tpu.memory_space<vmem>>, vector<1x2x8xf32>
    %155 = vector.shape_cast %154 : vector<1x2x8xf32> to vector<2x8xf32>
    %156 = vector.shape_cast %155 : vector<2x8xf32> to vector<2x8x1xf32>
    %157 = vector.broadcast %156 : vector<2x8x1xf32> to vector<2x8x16xf32>
    %158 = arith.mulf %157, %153 : vector<2x8x16xf32>
    %cst_83 = arith.constant dense<0.000000e+00> : vector<2x16xf32>
    %159 = vector.multi_reduction <add>, %158, %cst_83 [1] : vector<2x8x16xf32> to vector<2x16xf32>
    %c6_84 = arith.constant 6 : index
    %c0_85 = arith.constant 0 : index
    %c0_86 = arith.constant 0 : index
    %160 = vector.load %arg6[%c6_84, %c0_85, %c0_86] : memref<8x2x16xf32, #tpu.memory_space<vmem>>, vector<1x2x16xf32>
    %161 = vector.shape_cast %160 : vector<1x2x16xf32> to vector<2x16xf32>
    %162 = vector.shape_cast %159 : vector<2x16xf32> to vector<1x2x16xf32>
    tpu.vector_store %arg6[%c6_84, %c0_85, %c0_86], %162 {strides = array<i32>} : memref<8x2x16xf32, #tpu.memory_space<vmem>>, vector<1x2x16xf32>,
    %c6_87 = arith.constant 6 : index
    %c0_88 = arith.constant 0 : index
    %c0_89 = arith.constant 0 : index
    %163 = vector.load %arg4[%c6_87, %c0_88, %c0_89] : memref<8x2x16xf32, #tpu.memory_space<vmem>>, vector<1x2x16xf32>
    %164 = vector.shape_cast %163 : vector<1x2x16xf32> to vector<2x16xf32>
    %165 = vector.shape_cast %164 : vector<2x16xf32> to vector<2x1x16xf32>
    %c6_90 = arith.constant 6 : index
    %c0_91 = arith.constant 0 : index
    %c0_92 = arith.constant 0 : index
    %166 = vector.load %arg5[%c6_90, %c0_91, %c0_92] : memref<8x2x16xf32, #tpu.memory_space<vmem>>, vector<1x2x16xf32>
    %167 = vector.shape_cast %166 : vector<1x2x16xf32> to vector<2x16xf32>
    %168 = vector.shape_cast %167 : vector<2x16xf32> to vector<2x1x16xf32>
    %169 = vector.broadcast %156 : vector<2x8x1xf32> to vector<2x8x16xf32>
    %170 = vector.broadcast %165 : vector<2x1x16xf32> to vector<2x8x16xf32>
    %171 = arith.mulf %169, %170 : vector<2x8x16xf32>
    %cst_93 = arith.constant 1.000000e+00 : f32
    %172 = vector.broadcast %cst_93 : f32 to vector<2x8x16xf32>
    %173 = arith.subf %172, %171 : vector<2x8x16xf32>
    %174 = arith.mulf %153, %173 : vector<2x8x16xf32>
    %175 = vector.broadcast %156 : vector<2x8x1xf32> to vector<2x8x16xf32>
    %176 = vector.broadcast %168 : vector<2x1x16xf32> to vector<2x8x16xf32>
    %177 = arith.mulf %175, %176 : vector<2x8x16xf32>
    %178 = arith.addf %174, %177 : vector<2x8x16xf32>
    %c7 = arith.constant 7 : index
    %c0_94 = arith.constant 0 : index
    %c0_95 = arith.constant 0 : index
    %179 = vector.load %arg3[%c7, %c0_94, %c0_95] : memref<8x2x8xf32, #tpu.memory_space<vmem>>, vector<1x2x8xf32>
    %180 = vector.shape_cast %179 : vector<1x2x8xf32> to vector<2x8xf32>
    %181 = vector.shape_cast %180 : vector<2x8xf32> to vector<2x8x1xf32>
    %182 = vector.broadcast %181 : vector<2x8x1xf32> to vector<2x8x16xf32>
    %183 = arith.mulf %182, %178 : vector<2x8x16xf32>
    %cst_96 = arith.constant dense<0.000000e+00> : vector<2x16xf32>
    %184 = vector.multi_reduction <add>, %183, %cst_96 [1] : vector<2x8x16xf32> to vector<2x16xf32>
    %c7_97 = arith.constant 7 : index
    %c0_98 = arith.constant 0 : index
    %c0_99 = arith.constant 0 : index
    %185 = vector.load %arg6[%c7_97, %c0_98, %c0_99] : memref<8x2x16xf32, #tpu.memory_space<vmem>>, vector<1x2x16xf32>
    %186 = vector.shape_cast %185 : vector<1x2x16xf32> to vector<2x16xf32>
    %187 = vector.shape_cast %184 : vector<2x16xf32> to vector<1x2x16xf32>
    tpu.vector_store %arg6[%c7_97, %c0_98, %c0_99], %187 {strides = array<i32>} : memref<8x2x16xf32, #tpu.memory_space<vmem>>, vector<1x2x16xf32>,
    %c7_100 = arith.constant 7 : index
    %c0_101 = arith.constant 0 : index
    %c0_102 = arith.constant 0 : index
    %188 = vector.load %arg4[%c7_100, %c0_101, %c0_102] : memref<8x2x16xf32, #tpu.memory_space<vmem>>, vector<1x2x16xf32>
    %189 = vector.shape_cast %188 : vector<1x2x16xf32> to vector<2x16xf32>
    %190 = vector.shape_cast %189 : vector<2x16xf32> to vector<2x1x16xf32>
    %c7_103 = arith.constant 7 : index
    %c0_104 = arith.constant 0 : index
    %c0_105 = arith.constant 0 : index
    %191 = vector.load %arg5[%c7_103, %c0_104, %c0_105] : memref<8x2x16xf32, #tpu.memory_space<vmem>>, vector<1x2x16xf32>
    %192 = vector.shape_cast %191 : vector<1x2x16xf32> to vector<2x16xf32>
    %193 = vector.shape_cast %192 : vector<2x16xf32> to vector<2x1x16xf32>
    %194 = vector.broadcast %181 : vector<2x8x1xf32> to vector<2x8x16xf32>
    %195 = vector.broadcast %190 : vector<2x1x16xf32> to vector<2x8x16xf32>
    %196 = arith.mulf %194, %195 : vector<2x8x16xf32>
    %cst_106 = arith.constant 1.000000e+00 : f32
    %197 = vector.broadcast %cst_106 : f32 to vector<2x8x16xf32>
    %198 = arith.subf %197, %196 : vector<2x8x16xf32>
    %199 = arith.mulf %178, %198 : vector<2x8x16xf32>
    %200 = vector.broadcast %181 : vector<2x8x1xf32> to vector<2x8x16xf32>
    %201 = vector.broadcast %193 : vector<2x1x16xf32> to vector<2x8x16xf32>
    %202 = arith.mulf %200, %201 : vector<2x8x16xf32>
    %203 = arith.addf %199, %202 : vector<2x8x16xf32>
    %c0_107 = arith.constant 0 : index
    %c0_108 = arith.constant 0 : index
    %c0_109 = arith.constant 0 : index
    %204 = vector.load %arg7[%c0_107, %c0_108, %c0_109] : memref<2x8x16xf32, #tpu.memory_space<vmem>>, vector<2x8x16xf32>
    tpu.vector_store %arg7[%c0_107, %c0_108, %c0_109], %203 {strides = array<i32>} : memref<2x8x16xf32, #tpu.memory_space<vmem>>, vector<2x8x16xf32>,
    return
  }
  func.func @transform_0(%arg0: i32, %arg1: i32) -> (i32, i32) {
    %c0_i32 = arith.constant 0 : i32
    %c0_i32_0 = arith.constant 0 : i32
    %c0_i32_1 = arith.constant 0 : i32
    return %c0_i32, %c0_i32_0 : i32, i32
  }
  func.func @transform_1(%arg0: i32, %arg1: i32) -> (i32, i32, i32) {
    %c0_i32 = arith.constant 0 : i32
    %c0_i32_0 = arith.constant 0 : i32
    return %arg1, %arg0, %c0_i32 : i32, i32, i32
  }
  func.func @transform_2(%arg0: i32, %arg1: i32) -> (i32, i32, i32) {
    %c0_i32 = arith.constant 0 : i32
    %c0_i32_0 = arith.constant 0 : i32
    return %arg1, %arg0, %c0_i32 : i32, i32, i32
  }
  func.func @transform_3(%arg0: i32, %arg1: i32) -> (i32, i32, i32) {
    %c0_i32 = arith.constant 0 : i32
    %c0_i32_0 = arith.constant 0 : i32
    return %arg1, %arg0, %c0_i32 : i32, i32, i32
  }
  func.func @transform_4(%arg0: i32, %arg1: i32) -> (i32, i32, i32) {
    %c0_i32 = arith.constant 0 : i32
    %c0_i32_0 = arith.constant 0 : i32
    return %arg1, %arg0, %c0_i32 : i32, i32, i32
  }
}

</mosaic_0001>

<bundles_post_ra>
// kernel: deep_gpcm_coral_forward.1
= control target key start
LH: loop header
LB: loop body
LE: loop exit
PB: predicated region body
PF: predicated region fallthrough
CT: control target
= control target key end

     0   :  { %v28_v0 = vlaneseq  ;;  %vm22_vm0 = vcmask 130048   ;;  %v1021_v1 = vmov 1966171168   ;;  %vm61_vm1 = vcmask 1041409   ;;  %s1420_s1 = inlined_call_operand.vmem [shape: f32[8,2,8], index: 1, kind: input, shape index: {}]   ;;  %s1421_s0 = inlined_call_operand.vmem [shape: f32[8,16], index: 0, kind: input, shape index: {}]   ;;  %s1422_s2 = inlined_call_operand.vmem [shape: f32[8,2,16], index: 2, kind: input, shape index: {}]   ;;  %s1423_s3 = inlined_call_operand.vmem [shape: f32[8,2,16], index: 3, kind: input, shape index: {}]   ;;  %s1424_s4 = inlined_call_operand.vmem [shape: f32[8,2,16], index: 4, kind: output, shape index: {}]  }
   0x1   :  { %v77_v2 = vunpack.c.l.s4 %v1021_v1  ;;  %v21_v4 = vld [vmem:[%s1421_s0] sm:$0xff]  ;;  %v1097_v26 = vld [vmem:[%s1420_s1 + $0x8] sm:$0x3]  ;;  %vm64_vm2 = vcmask 123904  }
   0x2   :  { %v29_v3 = vshrl.u32 %v28_v0, 7  ;;  %v27_v5 = vld [vmem:[%s1420_s1] sm:$0x3]  ;;  %v978_v6 = vld [vmem:[%s1420_s1 + $0x2] sm:$0x3]  ;;  %23 = vst.msk [vmem:[#allocation2] sm:$0xff] %vm22_vm0, %v21_v4 }
   0x3   :  { %v78_v7 = vunpack.c.0.s8 %v77_v2  ;;  %24 = vst.msk [vmem:[#allocation2 + $0x8] sm:$0xff] %vm22_vm0, %v21_v4  ;;  %v984_v10 = vld [vmem:[%s1420_s1 + $0x4] sm:$0x3]  ;;  %v1073_v14 = vld [vmem:[%s1420_s1 + $0x6] sm:$0x3] }
   0x4   :  { %v1058_v8 = vsub.s32 0, %v29_v3  ;;  %v1060_v9 = vsub.s32 1, %v29_v3  ;;  %v976_v11 = vld.sshfl [vmem:[%s1422_s2] sm:$0x11 pattern:$0x75316420] }
   0x5   :  { %v1075_v15 = vsub.s32 %v78_v7, %v29_v3  ;;  %v977_v16 = vld.sshfl [vmem:[%s1423_s3] sm:$0x11 pattern:$0x75316420]  ;;  %v75_v18 = vcombine.high %v976_v11, %v976_v11 }
   0x6   :  { %v31_v12 = vrot.slane %v27_v5, %v1058_v8  ;;  %v149_v13 = vrot.slane %v978_v6, %v1058_v8  ;;  %v981_v17 = vld.sshfl [vmem:[%s1422_s2 + $0x2] sm:$0x11 pattern:$0x75316420]  ;;  %v38_v19 = vrot.slane %v27_v5, %v1060_v9  ;;  %v156_v20 = vrot.slane %v978_v6, %v1060_v9 }
   0x7   :  { %v983_v21 = vld.sshfl [vmem:[%s1423_s3 + $0x2] sm:$0x11 pattern:$0x75316420]  ;;  %v267_v22 = vrot.slane %v984_v10, %v1058_v8  ;;  %v274_v23 = vrot.slane %v984_v10, %v1060_v9  ;;  %v385_v24 = vrot.slane %v1073_v14, %v1058_v8  ;;  %v392_v25 = vrot.slane %v1073_v14, %v1060_v9 }
   0x8   :  { %33 = vbcast.lane.b32.xlu0 %v31_v12, 256  ;;  %151 = vbcast.lane.b32.xlu1 %v149_v13, 256  ;;  %v82_v27 = vrot.slane %v976_v11, %v1075_v15  ;;  %v106_v28 = vrot.slane %v977_v16, %v1075_v15  ;;  %v199_v29 = vrot.slane %v981_v17, %v1075_v15  ;;  %v987_v34 = vld.sshfl [vmem:[%s1422_s2 + $0x4] sm:$0x11 pattern:$0x75316420] }
   0x9   :  { %v224_v30 = vrot.slane %v983_v21, %v1075_v15  ;;  %v1104_v31 = vrot.slane %v75_v18, %v1075_v15  ;;  %v99_v32 = vcombine.high %v977_v16, %v977_v16  ;;  %v192_v33 = vcombine.high %v981_v17, %v981_v17  ;;  %v989_v38 = vld.sshfl [vmem:[%s1423_s3 + $0x4] sm:$0x11 pattern:$0x75316420]  ;;  %v1002_v12 = vld [vmem:[%s1420_s1 + $0xa] sm:$0x3] }
   0xa   :  { %v1110_v35 = vrot.slane %v82_v27, %v1058_v8  ;;  %v1113_v36 = vrot.slane %v106_v28, %v1058_v8  ;;  %v1116_v37 = vrot.slane %v199_v29, %v1058_v8  ;;  %v503_v39 = vrot.slane %v1097_v26, %v1058_v8  ;;  %v993_v47 = vld.sshfl [vmem:[%s1422_s2 + $0x6] sm:$0x11 pattern:$0x75316420]  ;;  %v1008_v28 = vld [vmem:[%s1420_s1 + $0xc] sm:$0x3] }
   0xb   :  { %v1124_v40 = vrot.slane %v224_v30, %v1058_v8  ;;  %v1127_v41 = vrot.slane %v99_v32, %v1075_v15  ;;  %v121_v42 = vrot.slane %v1104_v31, %v1058_v8  ;;  %v510_v43 = vrot.slane %v1097_v26, %v1060_v9  ;;  %v995_v52 = vld.sshfl [vmem:[%s1423_s3 + $0x6] sm:$0x11 pattern:$0x75316420] }
   0xc   :  { %40 = vbcast.lane.b32.xlu0 %v38_v19, 256  ;;  %158 = vbcast.lane.b32.xlu1 %v156_v20, 256  ;;  %v1134_v44 = vrot.slane %v192_v33, %v1075_v15  ;;  %v217_v45 = vcombine.high %v983_v21, %v983_v21  ;;  %v317_v46 = vrot.slane %v987_v34, %v1075_v15  ;;  %v999_v56 = vld.sshfl [vmem:[%s1422_s2 + $0x8] sm:$0x11 pattern:$0x75316420] }
   0xd   :  { %v137_v48 = vrot.slane %v1127_v41, %v1058_v8  ;;  %v342_v49 = vrot.slane %v989_v38, %v1075_v15  ;;  %v310_v50 = vcombine.high %v987_v34, %v987_v34  ;;  %v335_v51 = vcombine.high %v989_v38, %v989_v38  ;;  %v1001_v1 = vld.sshfl [vmem:[%s1423_s3 + $0x8] sm:$0x11 pattern:$0x75316420] }
   0xe   :  { %v1147_v53 = vrot.slane %v217_v45, %v1075_v15  ;;  %v239_v54 = vrot.slane %v1134_v44, %v1058_v8  ;;  %v1152_v55 = vrot.slane %v317_v46, %v1058_v8  ;;  %v435_v60 = vrot.slane %v993_v47, %v1075_v15  ;;  %v1005_v11 = vld.sshfl [vmem:[%s1422_s2 + $0xa] sm:$0x11 pattern:$0x75316420] }
   0xf   :  { %v1158_v57 = vrot.slane %v342_v49, %v1058_v8  ;;  %v1161_v58 = vrot.slane %v310_v50, %v1075_v15  ;;  %v1164_v59 = vrot.slane %v335_v51, %v1075_v15  ;;  %v460_v62 = vrot.slane %v995_v52, %v1075_v15  ;;  %v1011_v38 = vld.sshfl [vmem:[%s1422_s2 + $0xc] sm:$0x11 pattern:$0x75316420]  ;;  %v1014_v51 = vld [vmem:[%s1420_s1 + $0xe] sm:$0x3] }
  0x10   :  { %269 = vbcast.lane.b32.xlu0 %v267_v22, 256  ;;  %276 = vbcast.lane.b32.xlu1 %v274_v23, 256  ;;  %v255_v61 = vrot.slane %v1147_v53, %v1058_v8  ;;  %v428_v63 = vcombine.high %v993_v47, %v993_v47  ;;  %v453_v0 = vcombine.high %v995_v52, %v995_v52  ;;  %v1013_v50 = vld.sshfl [vmem:[%s1423_s3 + $0xc] sm:$0x11 pattern:$0x75316420] }
  0x11   :  { %v357_v2 = vrot.slane %v1161_v58, %v1058_v8  ;;  %v373_v3 = vrot.slane %v1164_v59, %v1058_v8  ;;  %v1178_v4 = vrot.slane %v435_v60, %v1058_v8  ;;  %v553_v5 = vrot.slane %v999_v56, %v1075_v15 }
  0x12   :  { %v1182_v6 = vrot.slane %v460_v62, %v1058_v8  ;;  %v1185_v7 = vrot.slane %v428_v63, %v1075_v15  ;;  %v1188_v10 = vrot.slane %v453_v0, %v1075_v15  ;;  %v578_v13 = vrot.slane %v1001_v1, %v1075_v15 }
  0x13   :  { %v1198_v14 = vrot.slane %v553_v5, %v1058_v8  ;;  %v546_v16 = vcombine.high %v999_v56, %v999_v56  ;;  %v571_v17 = vcombine.high %v1001_v1, %v1001_v1  ;;  %v671_v20 = vrot.slane %v1005_v11, %v1075_v15 }
  0x14   :  { %387 = vbcast.lane.b32.xlu0 %v385_v24, 256  ;;  %394 = vbcast.lane.b32.xlu1 %v392_v25, 256  ;;  %v475_v18 = vrot.slane %v1185_v7, %v1058_v8  ;;  %v491_v19 = vrot.slane %v1188_v10, %v1058_v8  ;;  %v1206_v21 = vrot.slane %v578_v13, %v1058_v8  ;;  %v1007_v24 = vld.sshfl [vmem:[%s1423_s3 + $0xa] sm:$0x11 pattern:$0x75316420] }
  0x15   :  { %v1209_v22 = vrot.slane %v546_v16, %v1075_v15  ;;  %v1212_v23 = vrot.slane %v571_v17, %v1075_v15  ;;  %v621_v25 = vrot.slane %v1002_v12, %v1058_v8  ;;  %v628_v26 = vrot.slane %v1002_v12, %v1060_v9 }
  0x16   :  { %v1220_v27 = vrot.slane %v671_v20, %v1058_v8  ;;  %v696_v32 = vrot.slane %v1007_v24, %v1075_v15  ;;  %v664_v33 = vcombine.high %v1005_v11, %v1005_v11  ;;  %v689_v34 = vcombine.high %v1007_v24, %v1007_v24  ;;  %v1017_v11 = vld.sshfl [vmem:[%s1422_s2 + $0xe] sm:$0x11 pattern:$0x75316420] }
  0x17   :  { %v593_v29 = vrot.slane %v1209_v22, %v1058_v8  ;;  %v609_v30 = vrot.slane %v1212_v23, %v1058_v8  ;;  %v789_v45 = vrot.slane %v1011_v38, %v1075_v15  ;;  %v739_v46 = vrot.slane %v1008_v28, %v1058_v8 }
  0x18   :  { %505 = vbcast.lane.b32.xlu0 %v503_v39, 256  ;;  %512 = vbcast.lane.b32.xlu1 %v510_v43, 256  ;;  %v1234_v39 = vrot.slane %v696_v32, %v1058_v8  ;;  %v1237_v43 = vrot.slane %v664_v33, %v1075_v15  ;;  %v746_v47 = vrot.slane %v1008_v28, %v1060_v9 }
  0x19   :  { %v1243_v49 = vrot.slane %v689_v34, %v1075_v15  ;;  %v1254_v56 = vrot.slane %v789_v45, %v1058_v8  ;;  %v814_v62 = vrot.slane %v1013_v50, %v1075_v15  ;;  %v782_v63 = vcombine.high %v1011_v38, %v1011_v38 }
  0x1a   :  { %v711_v52 = vrot.slane %v1237_v43, %v1058_v8  ;;  %v807_v0 = vcombine.high %v1013_v50, %v1013_v50  ;;  %v857_v1 = vrot.slane %v1014_v51, %v1058_v8  ;;  %v864_v5 = vrot.slane %v1014_v51, %v1060_v9 }
  0x1b   :  { %v727_v60 = vrot.slane %v1243_v49, %v1058_v8  ;;  %v1265_v12 = vrot.slane %v814_v62, %v1058_v8  ;;  %v1268_v13 = vrot.slane %v782_v63, %v1075_v15  ;;  %v907_v17 = vrot.slane %v1017_v11, %v1075_v15 }
  0x1c   :  { %623 = vbcast.lane.b32.xlu0 %v621_v25, 256  ;;  %630 = vbcast.lane.b32.xlu1 %v628_v26, 256  ;;  %v1271_v16 = vrot.slane %v807_v0, %v1075_v15  ;;  %v1019_v25 = vld.sshfl [vmem:[%s1423_s3 + $0xe] sm:$0x11 pattern:$0x75316420]  ;;  %v900_v28 = vcombine.high %v1017_v11, %v1017_v11 }
  0x1d   :  { %v829_v20 = vrot.slane %v1268_v13, %v1058_v8  ;;  %v1279_v24 = vrot.slane %v907_v17, %v1058_v8  ;;  %v932_v26 = vrot.slane %v1019_v25, %v1075_v15  ;;  %v925_v34 = vcombine.high %v1019_v25, %v1019_v25 }
  0x1e   :  { %v1289_v33 = vrot.slane %v900_v28, %v1075_v15 }
  0x1f   :  { %v1286_v32 = vrot.slane %v932_v26, %v1058_v8  ;;  %v1294_v45 = vrot.slane %v925_v34, %v1075_v15 }
  0x20   :  { %741 = vbcast.lane.b32.xlu0 %v739_v46, 256  ;;  %748 = vbcast.lane.b32.xlu1 %v746_v47, 256  ;;  %v25_v47 = vld [vmem:[#allocation2] sm:$0xff] }
  0x24   :  { %859 = vbcast.lane.b32.xlu0 %v857_v1, 256  ;;  %866 = vbcast.lane.b32.xlu1 %v864_v5, 256  ;;  %v26_v1 = vld [vmem:[#allocation2 + $0x8] sm:$0xff] }
  0x7a   :  { %v34_v50 = vpop.permute.xlu0 %33  ;;  %v152_v51 = vpop.permute.xlu1 %151 }
  0x7b   :  { %v42_v62 = vmul.f32 %v34_v50, %v25_v47  ;;  %v124_v63 = vmul.f32 %v1110_v35, %v34_v50  ;;  %v242_v0 = vmul.f32 %v1116_v37, %v152_v51  ;;  %v140_v25 = vmul.f32 %v1113_v36, %v34_v50 }
  0x7c   :  { %v258_v35 = vmul.f32 %v1124_v40, %v152_v51 }
  0x7d   :  { %v45_v5 = vsel %vm22_vm0, %v42_v62, 0.0  ;;  %v126_v11 = vsub.f32 1.0, %v124_v63  ;;  %v244_v34 = vsub.f32 1.0, %v242_v0 }
  0x7e   :  { %v46_v17 = vrot.slane %v45_v5, 4  ;;  %v41_v15 = vpop.permute.xlu0 %40  ;;  %v159_v26 = vpop.permute.xlu1 %158 }
  0x7f   :  { %v128_v28 = vmul.f32 %v126_v11, %v25_v47  ;;  %v43_v46 = vmul.f32 %v41_v15, %v26_v1  ;;  %v125_v38 = vmul.f32 %v121_v42, %v41_v15  ;;  %v243_v37 = vmul.f32 %v239_v54, %v159_v26 }
  0x80   :  { %v47_v9 = vadd.f32 %v46_v17, %v45_v5  ;;  %v141_v47 = vmul.f32 %v137_v48, %v41_v15  ;;  %v259_v31 = vmul.f32 %v255_v61, %v159_v26 }
  0x81   :  { %v142_v62 = vadd.f32 %v140_v25, %v128_v28  ;;  %v52_v63 = vsel %vm22_vm0, %v43_v46, 0.0  ;;  %v127_v36 = vsub.f32 1.0, %v125_v38  ;;  %v245_v11 = vsub.f32 1.0, %v243_v37 }
  0x82   :  { %v48_v50 = vrot.slane %v47_v9, 2  ;;  %v53_v0 = vrot.slane %v52_v63, 4  ;;  %v270_v40 = vpop.permute.xlu0 %269  ;;  %v277_v42 = vpop.permute.xlu1 %276 }
  0x83   :  { %v160_v5 = vmul.f32 %v152_v51, %v142_v62  ;;  %v246_v44 = vmul.f32 %v244_v34, %v142_v62  ;;  %v129_v54 = vmul.f32 %v127_v36, %v26_v1  ;;  %v360_v46 = vmul.f32 %v1152_v55, %v270_v40 }
  0x84   :  { %v49_v38 = vadd.f32 %v48_v50, %v47_v9  ;;  %v54_v17 = vadd.f32 %v53_v0, %v52_v63  ;;  %v376_v41 = vmul.f32 %v1158_v57, %v270_v40  ;;  %v361_v48 = vmul.f32 %v357_v2, %v277_v42 }
  0x85   :  { %v162_v53 = vsel %vm22_vm0, %v160_v5, 0.0  ;;  %v143_v61 = vadd.f32 %v141_v47, %v129_v54  ;;  %v260_v25 = vadd.f32 %v258_v35, %v246_v44  ;;  %v362_v15 = vsub.f32 1.0, %v360_v46 }
  0x86   :  { %v50_v51 = vrot.slane %v49_v38, 1  ;;  %v163_v28 = vrot.slane %v162_v53, 4  ;;  %v55_v34 = vrot.slane %v54_v17, 2  ;;  %v363_v1 = vsub.f32 1.0, %v361_v48  ;;  %v388_v2 = vpop.permute.xlu0 %387 }
  0x87   :  { %v161_v37 = vmul.f32 %v159_v26, %v143_v61  ;;  %v247_v55 = vmul.f32 %v245_v11, %v143_v61  ;;  %v278_v9 = vmul.f32 %v270_v40, %v260_v25  ;;  %v364_v62 = vmul.f32 %v362_v15, %v260_v25 }
  0x88   :  { %v51_v63 = vadd.f32 %v50_v51, %v49_v38  ;;  %v164_v36 = vadd.f32 %v163_v28, %v162_v53  ;;  %v56_v57 = vadd.f32 %v55_v34, %v54_v17  ;;  %v377_v58 = vmul.f32 %v373_v3, %v277_v42 }
  0x89   :  { %v169_v47 = vsel %vm22_vm0, %v161_v37, 0.0  ;;  %v280_v35 = vsel %vm22_vm0, %v278_v9, 0.0  ;;  %v261_v50 = vadd.f32 %v259_v31, %v247_v55  ;;  %v378_v0 = vadd.f32 %v376_v41, %v364_v62  ;;  %v395_v41 = vpop.permute.xlu1 %394 }
  0x8a   :  { %v165_v5 = vrot.slane %v164_v36, 2  ;;  %v57_v44 = vrot.slane %v56_v57, 1  ;;  %v170_v26 = vrot.slane %v169_v47, 4  ;;  %v281_v11 = vrot.slane %v280_v35, 4 }
  0x8b   :  { %v279_v40 = vmul.f32 %v277_v42, %v261_v50  ;;  %v365_v54 = vmul.f32 %v363_v1, %v261_v50  ;;  %v396_v46 = vmul.f32 %v388_v2, %v378_v0  ;;  %v478_v38 = vmul.f32 %v1178_v4, %v388_v2 }
  0x8c   :  { %v166_v17 = vadd.f32 %v165_v5, %v164_v36  ;;  %v58_v48 = vadd.f32 %v57_v44, %v56_v57  ;;  %v171_v59 = vadd.f32 %v170_v26, %v169_v47  ;;  %v282_v3 = vadd.f32 %v281_v11, %v280_v35  ;;  %v506_v36 = vpop.permute.xlu0 %505 }
  0x8d   :  { %v287_v53 = vsel %vm22_vm0, %v279_v40, 0.0  ;;  %v398_v61 = vsel %vm22_vm0, %v396_v46, 0.0  ;;  %v480_v25 = vsub.f32 1.0, %v478_v38  ;;  %v494_v31 = vmul.f32 %v1182_v6, %v388_v2  ;;  %v513_v46 = vpop.permute.xlu1 %512 }
  0x8e   :  { %v167_v15 = vrot.slane %v166_v17, 1  ;;  %v62_v51 = vsel %vm61_vm1, %v58_v48, %v51_v63  ;;  %v172_v42 = vrot.slane %v171_v59, 2  ;;  %v283_v28 = vrot.slane %v282_v3, 2 }
  0x8f   :  { %65 = vst.msk [vmem:[%s1424_s4] sm:$0x3] %vm64_vm2, %v62_v51  ;;  %v288_v4 = vrot.slane %v287_v53, 4  ;;  %v399_v34 = vrot.slane %v398_v61, 4  ;;  %v482_v1 = vmul.f32 %v480_v25, %v378_v0  ;;  %v379_v37 = vadd.f32 %v377_v58, %v365_v54 }
  0x90   :  { %v168_v55 = vadd.f32 %v167_v15, %v166_v17  ;;  %v173_v9 = vadd.f32 %v172_v42, %v171_v59  ;;  %v284_v62 = vadd.f32 %v283_v28, %v282_v3  ;;  %v479_v6 = vmul.f32 %v475_v18, %v395_v41  ;;  %v624_v28 = vpop.permute.xlu0 %623 }
  0x91   :  { %v289_v63 = vadd.f32 %v288_v4, %v287_v53  ;;  %v400_v57 = vadd.f32 %v399_v34, %v398_v61  ;;  %v397_v2 = vmul.f32 %v395_v41, %v379_v37  ;;  %v495_v47 = vmul.f32 %v491_v19, %v395_v41 }
  0x92   :  { %v174_v35 = vrot.slane %v173_v9, 1  ;;  %v285_v50 = vrot.slane %v284_v62, 1  ;;  %v481_v5 = vsub.f32 1.0, %v479_v6  ;;  %v496_v0 = vadd.f32 %v494_v31, %v482_v1  ;;  %v631_v6 = vpop.permute.xlu1 %630 }
  0x93   :  { %v290_v58 = vrot.slane %v289_v63, 2  ;;  %v401_v44 = vrot.slane %v400_v57, 2  ;;  %v405_v26 = vsel %vm22_vm0, %v397_v2, 0.0  ;;  %v596_v11 = vmul.f32 %v1198_v14, %v506_v36 }
  0x94   :  { %v175_v7 = vadd.f32 %v174_v35, %v173_v9  ;;  %v286_v18 = vadd.f32 %v285_v50, %v284_v62  ;;  %v406_v40 = vrot.slane %v405_v26, 4  ;;  %v483_v54 = vmul.f32 %v481_v5, %v379_v37 }
  0x95   :  { %v291_v38 = vadd.f32 %v290_v58, %v289_v63  ;;  %v402_v17 = vadd.f32 %v401_v44, %v400_v57  ;;  %v514_v48 = vmul.f32 %v506_v36, %v496_v0  ;;  %v598_v10 = vsub.f32 1.0, %v596_v11 }
  0x96   :  { %v178_v19 = vsel %vm61_vm1, %v175_v7, %v168_v55  ;;  %v407_v59 = vadd.f32 %v406_v40, %v405_v26  ;;  %v612_v3 = vmul.f32 %v1206_v21, %v506_v36  ;;  %v497_v53 = vadd.f32 %v495_v47, %v483_v54  ;;  %v742_v26 = vpop.permute.xlu0 %741 }
  0x97   :  { %979 = vst.msk [vmem:[%s1424_s4 + $0x2] sm:$0x3] %vm64_vm2, %v178_v19  ;;  %v292_v14 = vrot.slane %v291_v38, 1  ;;  %v403_v61 = vrot.slane %v402_v17, 1  ;;  %v516_v25 = vsel %vm22_vm0, %v514_v48, 0.0  ;;  %v600_v31 = vmul.f32 %v598_v10, %v496_v0  ;;  %v749_v48 = vpop.permute.xlu1 %748 }
  0x98   :  { %v408_v41 = vrot.slane %v407_v59, 2  ;;  %v517_v15 = vrot.slane %v516_v25, 4  ;;  %v515_v51 = vmul.f32 %v513_v46, %v497_v53  ;;  %v597_v42 = vmul.f32 %v593_v29, %v513_v46 }
  0x99   :  { %v293_v21 = vadd.f32 %v292_v14, %v291_v38  ;;  %v404_v4 = vadd.f32 %v403_v61, %v402_v17  ;;  %v613_v34 = vmul.f32 %v609_v30, %v513_v46  ;;  %v614_v1 = vadd.f32 %v612_v3, %v600_v31 }
  0x9a   :  { %v409_v37 = vadd.f32 %v408_v41, %v407_v59  ;;  %v518_v55 = vadd.f32 %v517_v15, %v516_v25  ;;  %v523_v9 = vsel %vm22_vm0, %v515_v51, 0.0  ;;  %v599_v62 = vsub.f32 1.0, %v597_v42  ;;  %v860_v51 = vpop.permute.xlu0 %859 }
  0x9b   :  { %v296_v36 = vsel %vm61_vm1, %v293_v21, %v286_v18  ;;  %v524_v63 = vrot.slane %v523_v9, 4  ;;  %v632_v57 = vmul.f32 %v624_v28, %v614_v1  ;;  %v714_v22 = vmul.f32 %v1220_v27, %v624_v28 }
  0x9c   :  { %985 = vst.msk [vmem:[%s1424_s4 + $0x4] sm:$0x3] %vm64_vm2, %v296_v36  ;;  %v410_v23 = vrot.slane %v409_v37, 1  ;;  %v519_v29 = vrot.slane %v518_v55, 2  ;;  %v601_v30 = vmul.f32 %v599_v62, %v497_v53  ;;  %v730_v2 = vmul.f32 %v1234_v39, %v624_v28 }
  0x9d   :  { %v525_v47 = vadd.f32 %v524_v63, %v523_v9  ;;  %v634_v35 = vsel %vm22_vm0, %v632_v57, 0.0  ;;  %v716_v50 = vsub.f32 1.0, %v714_v22  ;;  %v715_v5 = vmul.f32 %v711_v52, %v631_v6 }
  0x9e   :  { %v411_v0 = vadd.f32 %v410_v23, %v409_v37  ;;  %v520_v27 = vadd.f32 %v519_v29, %v518_v55  ;;  %v635_v58 = vrot.slane %v634_v35, 4  ;;  %v615_v44 = vadd.f32 %v613_v34, %v601_v30 }
  0x9f   :  { %v526_v11 = vrot.slane %v525_v47, 2  ;;  %v718_v7 = vmul.f32 %v716_v50, %v614_v1  ;;  %v717_v18 = vsub.f32 1.0, %v715_v5  ;;  %v832_v17 = vmul.f32 %v1254_v56, %v742_v26 }
  0xa0   :  { %v414_v40 = vsel %vm61_vm1, %v411_v0, %v404_v4  ;;  %v521_v54 = vrot.slane %v520_v27, 1  ;;  %v636_v39 = vadd.f32 %v635_v58, %v634_v35  ;;  %v633_v46 = vmul.f32 %v631_v6, %v615_v44 }
  0xa1   :  { %991 = vst.msk [vmem:[%s1424_s4 + $0x6] sm:$0x3] %vm64_vm2, %v414_v40  ;;  %v527_v43 = vadd.f32 %v526_v11, %v525_v47  ;;  %v719_v52 = vmul.f32 %v717_v18, %v615_v44  ;;  %v732_v38 = vadd.f32 %v730_v2, %v718_v7  ;;  %v731_v59 = vmul.f32 %v727_v60, %v631_v6 }
  0xa2   :  { %v637_v10 = vrot.slane %v636_v39, 2  ;;  %v641_v19 = vsel %vm22_vm0, %v633_v46, 0.0  ;;  %v848_v3 = vmul.f32 %v1265_v12, %v742_v26  ;;  %v834_v25 = vsub.f32 1.0, %v832_v17 }
  0xa3   :  { %v528_v53 = vrot.slane %v527_v43, 1  ;;  %v642_v14 = vrot.slane %v641_v19, 4  ;;  %v750_v61 = vmul.f32 %v742_v26, %v732_v38  ;;  %v522_v31 = vadd.f32 %v521_v54, %v520_v27 }
  0xa4   :  { %v638_v41 = vadd.f32 %v637_v10, %v636_v39  ;;  %v733_v15 = vadd.f32 %v731_v59, %v719_v52  ;;  %v833_v56 = vmul.f32 %v829_v20, %v749_v48  ;;  %v836_v49 = vmul.f32 %v834_v25, %v732_v38  ;;  %v867_v20 = vpop.permute.xlu1 %866 }
  0xa5   :  { %v529_v42 = vadd.f32 %v528_v53, %v527_v43  ;;  %v643_v28 = vadd.f32 %v642_v14, %v641_v19  ;;  %v752_v21 = vsel %vm22_vm0, %v750_v61, 0.0  ;;  %v1425_v34 = vrot.slane %v1271_v16, %v1058_v8 }
  0xa6   :  { %v753_v60 = vrot.slane %v752_v21, 4  ;;  %v751_v4 = vmul.f32 %v749_v48, %v733_v15  ;;  %v835_v12 = vsub.f32 1.0, %v833_v56  ;;  %v850_v9 = vadd.f32 %v848_v3, %v836_v49 }
  0xa7   :  { %v849_v1 = vmul.f32 %v1425_v34, %v749_v48  ;;  %v532_v37 = vsel %vm61_vm1, %v529_v42, %v522_v31  ;;  %v644_v55 = vrot.slane %v643_v28, 2  ;;  %v950_v13 = vmul.f32 %v1279_v24, %v860_v51 }
  0xa8   :  { %997 = vst.msk [vmem:[%s1424_s4 + $0x8] sm:$0x3] %vm64_vm2, %v532_v37  ;;  %v639_v62 = vrot.slane %v638_v41, 1  ;;  %v754_v6 = vadd.f32 %v753_v60, %v752_v21  ;;  %v759_v36 = vsel %vm22_vm0, %v751_v4, 0.0  ;;  %v966_v63 = vmul.f32 %v1286_v32, %v860_v51 }
  0xa9   :  { %v645_v16 = vadd.f32 %v644_v55, %v643_v28  ;;  %v760_v57 = vrot.slane %v759_v36, 4  ;;  %v868_v22 = vmul.f32 %v860_v51, %v850_v9  ;;  %v952_v23 = vsub.f32 1.0, %v950_v13 }
  0xaa   :  { %v755_v29 = vrot.slane %v754_v6, 2  ;;  %v837_v30 = vmul.f32 %v835_v12, %v733_v15  ;;  %v1426_v24 = vrot.slane %v1289_v33, %v1058_v8  ;;  %v1427_v47 = vrot.slane %v1294_v45, %v1058_v8 }
  0xab   :  { %v646_v50 = vrot.slane %v645_v16, 1  ;;  %v761_v5 = vadd.f32 %v760_v57, %v759_v36  ;;  %v870_v0 = vsel %vm22_vm0, %v868_v22, 0.0  ;;  %v954_v27 = vmul.f32 %v952_v23, %v850_v9 }
  0xac   :  { %v951_v2 = vmul.f32 %v1426_v24, %v867_v20  ;;  %v967_v35 = vmul.f32 %v1427_v47, %v867_v20  ;;  %v756_v32 = vadd.f32 %v755_v29, %v754_v6  ;;  %v871_v58 = vrot.slane %v870_v0, 4 }
  0xad   :  { %v851_v44 = vadd.f32 %v849_v1, %v837_v30  ;;  %v640_v11 = vadd.f32 %v639_v62, %v638_v41  ;;  %v647_v7 = vadd.f32 %v646_v50, %v645_v16  ;;  %v762_v18 = vrot.slane %v761_v5, 2 }
  0xae   :  { %v953_v26 = vsub.f32 1.0, %v951_v2  ;;  %v968_v40 = vadd.f32 %v966_v63, %v954_v27  ;;  %v872_v54 = vadd.f32 %v871_v58, %v870_v0  ;;  %v757_v8 = vrot.slane %v756_v32, 1 }
  0xaf   :  { %v869_v33 = vmul.f32 %v867_v20, %v851_v44  ;;  %v650_v46 = vsel %vm61_vm1, %v647_v7, %v640_v11  ;;  %v763_v45 = vadd.f32 %v762_v18, %v761_v5 }
  0xb0   :  { %v955_v39 = vmul.f32 %v953_v26, %v851_v44  ;;  %970 = vst.msk [vmem:[#allocation2] sm:$0xff] %vm22_vm0, %v968_v40  ;;  %v873_v43 = vrot.slane %v872_v54, 2  ;;  %v758_v10 = vadd.f32 %v757_v8, %v756_v32 }
  0xb1   :  { %1003 = vst.msk [vmem:[%s1424_s4 + $0xa] sm:$0x3] %vm64_vm2, %v650_v46  ;;  %v877_v52 = vsel %vm22_vm0, %v869_v33, 0.0  ;;  %v764_v17 = vrot.slane %v763_v45, 1 }
  0xb2   :  { %v969_v38 = vadd.f32 %v967_v35, %v955_v39  ;;  %v878_v48 = vrot.slane %v877_v52, 4  ;;  %v874_v59 = vadd.f32 %v873_v43, %v872_v54 }
  0xb3   :  { %v765_v19 = vadd.f32 %v764_v17, %v763_v45 }
  0xb4   :  { %971 = vst.msk [vmem:[#allocation2 + $0x8] sm:$0xff] %vm22_vm0, %v969_v38  ;;  %v879_v3 = vadd.f32 %v878_v48, %v877_v52  ;;  %v875_v61 = vrot.slane %v874_v59, 1 }
  0xb5   :  { %v768_v53 = vsel %vm61_vm1, %v765_v19, %v758_v10 }
  0xb6   :  { %v880_v14 = vrot.slane %v879_v3, 2  ;;  %1009 = vst.msk [vmem:[%s1424_s4 + $0xc] sm:$0x3] %vm64_vm2, %v768_v53  ;;  %v876_v41 = vadd.f32 %v875_v61, %v874_v59 }
  0xb8   :  { %v881_v25 = vadd.f32 %v880_v14, %v879_v3 }
  0xba   :  { %v882_v31 = vrot.slane %v881_v25, 1 }
  0xbc   :  { %v883_v15 = vadd.f32 %v882_v31, %v881_v25 }
  0xbe   :  { %v886_v56 = vsel %vm61_vm1, %v883_v15, %v876_v41 }
  0xbf   :  { %1015 = vst.msk [vmem:[%s1424_s4 + $0xe] sm:$0x3] %vm64_vm2, %v886_v56 }

</bundles_post_ra>
